<compile_context>
chip_gen: v6e
topology: v6e:2x2x1
jax: 0.10.0
libtpu: 0.0.40
codegen_flags: <defaults>
</compile_context>

<pallas_src>
import functools

import jax
import jax.numpy as jnp
from jax.experimental import pallas as pl
from jax.experimental.pallas import tpu as pltpu

LANE = 128


def _round_up(x, m):
    return ((x + m - 1) // m) * m


# -----------------------------------------------------------------------------
# Kernel: encoder MLP -> Gaussian reparameterization -> decoder MLP -> sigmoid
# -----------------------------------------------------------------------------
def _vae_fwd_kernel(
    latent_dim, compute_dtype,
    # inputs (one batch tile + VMEM-resident weights)
    x_ref, eps_ref,
    we0_ref, be0_ref, we1_ref, be1_ref,
    wmu_ref, bmu_ref, wlv_ref, blv_ref,
    wd0_ref, bd0_ref, wd1_ref, bd1_ref, wd2_ref, bd2_ref,
    # outputs
    latent_ref, xdec_ref,
):
    f32 = jnp.float32
    cd = compute_dtype
    L = latent_dim

    # ----- encoder MLP: Linear -> ReLU -> Linear -> ReLU -> (mu | logvar) heads ---
    h = jnp.dot(x_ref[...], we0_ref[...], preferred_element_type=f32) + be0_ref[...]
    h = jnp.maximum(h, 0.0).astype(cd)
    h = jnp.dot(h, we1_ref[...], preferred_element_type=f32) + be1_ref[...]
    h = jnp.maximum(h, 0.0).astype(cd)

    mu_E = jnp.dot(h, wmu_ref[...], preferred_element_type=f32) + bmu_ref[...]
    log_var_E = jnp.dot(h, wlv_ref[...], preferred_element_type=f32) + blv_ref[...]

    # ----- Gaussian reparameterization ------------------------------------------
    z = mu_E + jnp.exp(0.5 * log_var_E) * eps_ref[...]

    # Packed latent output: [mu_E | log_var_E | z | zero-pad] as ONE lane-dense
    # full-width (TB, 128) store (unmasked vst + contiguous HBM writeback).
    tb = mu_E.shape[0]
    pad = latent_ref.shape[1] - 3 * L
    packed = jnp.concatenate(
        [mu_E, log_var_E, z, jnp.zeros((tb, pad), f32)], axis=1)
    latent_ref[...] = packed

    # ----- decoder MLP: Linear -> ReLU -> Linear -> ReLU -> Linear -> Sigmoid ----
    d = jnp.dot(z.astype(cd), wd0_ref[...], preferred_element_type=f32) + bd0_ref[...]
    d = jnp.maximum(d, 0.0).astype(cd)
    d = jnp.dot(d, wd1_ref[...], preferred_element_type=f32) + bd1_ref[...]
    d = jnp.maximum(d, 0.0).astype(cd)
    logits = jnp.dot(d, wd2_ref[...], preferred_element_type=f32) + bd2_ref[...]
    xdec_ref[...] = jax.nn.sigmoid(logits)  # Bernoulli decoder -> Sigmoid


# -----------------------------------------------------------------------------
# Wrapper
# -----------------------------------------------------------------------------
def vae_forward_pallas(x_nchw, eps, params, *, latent_dim, img_channels, img_dim,
                       compute_dtype=jnp.bfloat16, max_batch_tile=512):
    B = x_nchw.shape[0]
    input_size = img_channels * img_dim * img_dim
    L = latent_dim
    latent_cols = max(LANE, _round_up(3 * L, LANE))   # lane-dense latent output

    (we0, be0, we1, be1, we2, be2, wd0, bd0, wd1, bd1, wd2, bd2) = params

    # Split encoder head (torch.chunk(alpha, 2, dim=1) equivalent, done on weights).
    wmu, wlv = we2[:, :L], we2[:, L:]
    bmu, blv = be2[:, :L], be2[:, L:]

    # Flatten (nn.Flatten on NCHW) and pad batch to the f32 sublane quantum / tile.
    x_flat = x_nchw.reshape(B, input_size)
    B_pad = max(8, _round_up(B, 8))
    TB = min(max_batch_tile, B_pad)          # batch tile (v7x-safe VMEM budget)
    B_pad = _round_up(B_pad, TB)
    if B_pad != B:
        x_flat = jnp.pad(x_flat, ((0, B_pad - B), (0, 0)))
        eps_p = jnp.pad(eps, ((0, B_pad - B), (0, 0)))
    else:
        eps_p = eps

    cd = compute_dtype
    # bf16 weights/activations for the MXU-native path; biases stay f32.
    x_c = x_flat.astype(cd)
    we0c, we1c, wmuc, wlvc = (a.astype(cd) for a in (we0, we1, wmu, wlv))
    wd0c, wd1c, wd2c = (a.astype(cd) for a in (wd0, wd1, wd2))

    inputs = (x_c, eps_p,
              we0c, be0, we1c, be1, wmuc, bmu, wlvc, blv,
              wd0c, bd0, wd1c, bd1, wd2c, bd2)

    def batch_spec(ncols):
        return pl.BlockSpec((TB, ncols), lambda i: (i, 0))

    def resident_spec(arr):  # constant index_map -> weight stays VMEM-resident
        return pl.BlockSpec(arr.shape, lambda i: (0, 0))

    in_specs = ([batch_spec(input_size), batch_spec(L)]
                + [resident_spec(a) for a in inputs[2:]])
    out_specs = (batch_spec(latent_cols), batch_spec(input_size))
    out_shape = (jax.ShapeDtypeStruct((B_pad, latent_cols), jnp.float32),
                 jax.ShapeDtypeStruct((B_pad, input_size), jnp.float32))

    h0, h1 = we0.shape[1], we1.shape[1]
    d0, d1 = wd0.shape[1], wd1.shape[1]
    flops = 2 * B_pad * (input_size * h0 + h0 * h1 + 2 * h1 * L
                         + L * d0 + d0 * d1 + d1 * input_size)
    bytes_in = sum(int(a.size) * a.dtype.itemsize for a in inputs)
    bytes_out = B_pad * (latent_cols + input_size) * 4
    cost = pl.CostEstimate(flops=int(flops),
                           transcendentals=int(B_pad * (L + input_size)),
                           bytes_accessed=int(bytes_in + bytes_out))

    latent, x_dec = pl.pallas_call(
        functools.partial(_vae_fwd_kernel, L, cd),
        grid=(B_pad // TB,),
        in_specs=in_specs,
        out_specs=out_specs,
        out_shape=out_shape,
        compiler_params=pltpu.CompilerParams(
            dimension_semantics=("parallel",)),   # v7x: shard batch across 2 TCs
        cost_estimate=cost,
    )(*inputs)

    mu_E = latent[:B, 0:L]
    log_var_E = latent[:B, L:2 * L]
    z = latent[:B, 2 * L:3 * L]
    x_tilde = x_dec[:B].reshape(B, img_channels, img_dim, img_dim)
    # enforce_positivity=False in this config -> no abs/EPS applied.
    return {"mu_E": mu_E, "log_var_E": log_var_E, "z": z, "x_tilde": x_tilde}


# -----------------------------------------------------------------------------
# Deterministic parameter init (PyTorch nn.Linear-style uniform, fixed PRNG key)
# -----------------------------------------------------------------------------
def _init_linear(key, fan_in, fan_out):
    # weights stored transposed relative to PyTorch: (fan_in, fan_out) so that
    # y = x @ W + b ; bias stored as (1, fan_out) for 2-D VMEM friendliness.
    kw, kb = jax.random.split(key)
    bound = 1.0 / jnp.sqrt(float(fan_in))
    w = jax.random.uniform(kw, (fan_in, fan_out), jnp.float32, -bound, bound)
    b = jax.random.uniform(kb, (1, fan_out), jnp.float32, -bound, bound)
    return w, b


def make_params(key, input_size, hid_enc, hid_dec, latent_dim):
    keys = jax.random.split(key, 6)
    # encoder: input_size -> hid_enc[0] -> hid_enc[1] -> 2*latent_dim
    we0, be0 = _init_linear(keys[0], input_size, hid_enc[0])
    we1, be1 = _init_linear(keys[1], hid_enc[0], hid_enc[1])
    we2, be2 = _init_linear(keys[2], hid_enc[1], 2 * latent_dim)
    # decoder: latent_dim -> hid_dec[0] -> hid_dec[1] -> input_size
    wd0, bd0 = _init_linear(keys[3], latent_dim, hid_dec[0])
    wd1, bd1 = _init_linear(keys[4], hid_dec[0], hid_dec[1])
    wd2, bd2 = _init_linear(keys[5], hid_dec[1], input_size)
    return (we0, be0, we1, be1, we2, be2, wd0, bd0, wd1, bd1, wd2, bd2)


# -----------------------------------------------------------------------------
# Pure-JAX reference (same bf16 compute-dtype casts as the kernel)
# -----------------------------------------------------------------------------
def vae_forward_ref(x_nchw, eps, params, *, latent_dim, img_channels, img_dim,
                    compute_dtype=jnp.bfloat16):
    (we0, be0, we1, be1, we2, be2, wd0, bd0, wd1, bd1, wd2, bd2) = params
    cd = compute_dtype
    f32 = jnp.float32
    B = x_nchw.shape[0]
    L = latent_dim
    x = x_nchw.reshape(B, -1).astype(cd)
    h = jnp.maximum(jnp.dot(x, we0.astype(cd), preferred_element_type=f32) + be0, 0.0).astype(cd)
    h = jnp.maximum(jnp.dot(h, we1.astype(cd), preferred_element_type=f32) + be1, 0.0).astype(cd)
    alpha = jnp.dot(h, we2.astype(cd), preferred_element_type=f32) + be2
    mu_E = alpha[:, :L]
    log_var_E = alpha[:, L:]
    z = mu_E + jnp.exp(0.5 * log_var_E) * eps
    d = jnp.maximum(jnp.dot(z.astype(cd), wd0.astype(cd), preferred_element_type=f32) + bd0, 0.0).astype(cd)
    d = jnp.maximum(jnp.dot(d, wd1.astype(cd), preferred_element_type=f32) + bd1, 0.0).astype(cd)
    x_dec = jax.nn.sigmoid(jnp.dot(d, wd2.astype(cd), preferred_element_type=f32) + bd2)
    x_tilde = x_dec.reshape(B, img_channels, img_dim, img_dim)
    return {"mu_E": mu_E, "log_var_E": log_var_E, "z": z, "x_tilde": x_tilde}


# -----------------------------------------------------------------------------
# Main
# -----------------------------------------------------------------------------
if __name__ == "__main__":
    B = 2
    img_channels, img_dim = 4, 16
    input_size = img_channels * img_dim * img_dim          # 1024
    hid_enc = [32, 32]
    hid_dec = [32, 32]
    latent_dim = 8

    key = jax.random.PRNGKey(0)
    k_x, k_eps, k_params = jax.random.split(key, 3)

    x = jax.random.uniform(k_x, (B, img_channels, img_dim, img_dim), jnp.float32)
    # torch.randn_like(log_var_E) equivalent — fixed key so the run is deterministic
    eps = jax.random.normal(k_eps, (B, latent_dim), jnp.float32)

    params = make_params(k_params, input_size, hid_enc, hid_dec, latent_dim)

    out = vae_forward_pallas(
        x, eps, params,
        latent_dim=latent_dim, img_channels=img_channels, img_dim=img_dim,
    )
    jax.block_until_ready(out)

    ref = vae_forward_ref(
        x, eps, params,
        latent_dim=latent_dim, img_channels=img_channels, img_dim=img_dim,
    )
    for name in ("mu_E", "log_var_E", "z", "x_tilde"):
        assert out[name].shape == ref[name].shape, name
        assert jnp.allclose(out[name], ref[name], atol=1e-3, rtol=1e-3), name

    assert out["x_tilde"].shape == (B, img_channels, img_dim, img_dim)
    print("KERNEL_OK")
</pallas_src>

<mosaic_0001>
module attributes {stable_mosaic.version = 11 : i64} {
  func.func @_vae_fwd_kernel(%arg0: i32, %arg1: memref<8x1024xbf16, #tpu.memory_space<vmem>>, %arg2: memref<8x8xf32, #tpu.memory_space<vmem>>, %arg3: memref<1024x32xbf16, #tpu.memory_space<vmem>>, %arg4: memref<1x32xf32, #tpu.memory_space<vmem>>, %arg5: memref<32x32xbf16, #tpu.memory_space<vmem>>, %arg6: memref<1x32xf32, #tpu.memory_space<vmem>>, %arg7: memref<32x8xbf16, #tpu.memory_space<vmem>>, %arg8: memref<1x8xf32, #tpu.memory_space<vmem>>, %arg9: memref<32x8xbf16, #tpu.memory_space<vmem>>, %arg10: memref<1x8xf32, #tpu.memory_space<vmem>>, %arg11: memref<8x32xbf16, #tpu.memory_space<vmem>>, %arg12: memref<1x32xf32, #tpu.memory_space<vmem>>, %arg13: memref<32x32xbf16, #tpu.memory_space<vmem>>, %arg14: memref<1x32xf32, #tpu.memory_space<vmem>>, %arg15: memref<32x1024xbf16, #tpu.memory_space<vmem>>, %arg16: memref<1x1024xf32, #tpu.memory_space<vmem>>, %arg17: memref<8x128xf32, #tpu.memory_space<vmem>>, %arg18: memref<8x1024xf32, #tpu.memory_space<vmem>>) attributes {dimension_semantics = [#tpu.dimension_semantics<parallel>], iteration_bounds = array<i64: 1>, scalar_prefetch = 0 : i64, scratch_operands = 0 : i64, tpu.core_type = #tpu.core_type<tc>, window_params = [{transform_indices = @transform_0, window_bounds = array<i64: 8, 1024>}, {transform_indices = @transform_1, window_bounds = array<i64: 8, 8>}, {pipeline_mode = #tpu.pipeline_mode<synchronous>, transform_indices = @transform_2, window_bounds = array<i64: 1024, 32>}, {pipeline_mode = #tpu.pipeline_mode<synchronous>, transform_indices = @transform_3, window_bounds = array<i64: 1, 32>}, {pipeline_mode = #tpu.pipeline_mode<synchronous>, transform_indices = @transform_4, window_bounds = array<i64: 32, 32>}, {pipeline_mode = #tpu.pipeline_mode<synchronous>, transform_indices = @transform_5, window_bounds = array<i64: 1, 32>}, {pipeline_mode = #tpu.pipeline_mode<synchronous>, transform_indices = @transform_6, window_bounds = array<i64: 32, 8>}, {pipeline_mode = #tpu.pipeline_mode<synchronous>, transform_indices = @transform_7, window_bounds = array<i64: 1, 8>}, {pipeline_mode = #tpu.pipeline_mode<synchronous>, transform_indices = @transform_8, window_bounds = array<i64: 32, 8>}, {pipeline_mode = #tpu.pipeline_mode<synchronous>, transform_indices = @transform_9, window_bounds = array<i64: 1, 8>}, {pipeline_mode = #tpu.pipeline_mode<synchronous>, transform_indices = @transform_10, window_bounds = array<i64: 8, 32>}, {pipeline_mode = #tpu.pipeline_mode<synchronous>, transform_indices = @transform_11, window_bounds = array<i64: 1, 32>}, {pipeline_mode = #tpu.pipeline_mode<synchronous>, transform_indices = @transform_12, window_bounds = array<i64: 32, 32>}, {pipeline_mode = #tpu.pipeline_mode<synchronous>, transform_indices = @transform_13, window_bounds = array<i64: 1, 32>}, {pipeline_mode = #tpu.pipeline_mode<synchronous>, transform_indices = @transform_14, window_bounds = array<i64: 32, 1024>}, {pipeline_mode = #tpu.pipeline_mode<synchronous>, transform_indices = @transform_15, window_bounds = array<i64: 1, 1024>}, {transform_indices = @transform_16, window_bounds = array<i64: 8, 128>}, {transform_indices = @transform_17, window_bounds = array<i64: 8, 1024>}]} {
    %c0 = arith.constant 0 : index
    %c0_0 = arith.constant 0 : index
    %0 = vector.load %arg1[%c0, %c0_0] : memref<8x1024xbf16, #tpu.memory_space<vmem>>, vector<8x1024xbf16>
    %c0_1 = arith.constant 0 : index
    %c0_2 = arith.constant 0 : index
    %1 = vector.load %arg3[%c0_1, %c0_2] : memref<1024x32xbf16, #tpu.memory_space<vmem>>, vector<1024x32xbf16>
    %cst = arith.constant dense<0.000000e+00> : vector<8x32xf32>
    %2 = tpu.matmul %0, %1, %cst {dimension_numbers = #tpu.dot_dimension_numbers<[1], [0], [0], [1], [0, 0, 1, 1], [], []>} : vector<8x1024xbf16>, vector<1024x32xbf16>, vector<8x32xf32> -> vector<8x32xf32>
    %c0_3 = arith.constant 0 : index
    %c0_4 = arith.constant 0 : index
    %3 = vector.load %arg4[%c0_3, %c0_4] : memref<1x32xf32, #tpu.memory_space<vmem>>, vector<1x32xf32>
    %4 = vector.broadcast %3 : vector<1x32xf32> to vector<8x32xf32>
    %5 = arith.addf %2, %4 : vector<8x32xf32>
    %cst_5 = arith.constant 0.000000e+00 : f32
    %6 = vector.broadcast %cst_5 : f32 to vector<8x32xf32>
    %7 = arith.maximumf %5, %6 : vector<8x32xf32>
    %8 = arith.truncf %7 : vector<8x32xf32> to vector<8x32xbf16>
    %c0_6 = arith.constant 0 : index
    %c0_7 = arith.constant 0 : index
    %9 = vector.load %arg5[%c0_6, %c0_7] : memref<32x32xbf16, #tpu.memory_space<vmem>>, vector<32x32xbf16>
    %cst_8 = arith.constant dense<0.000000e+00> : vector<8x32xf32>
    %10 = tpu.matmul %8, %9, %cst_8 {dimension_numbers = #tpu.dot_dimension_numbers<[1], [0], [0], [1], [0, 0, 1, 1], [], []>} : vector<8x32xbf16>, vector<32x32xbf16>, vector<8x32xf32> -> vector<8x32xf32>
    %c0_9 = arith.constant 0 : index
    %c0_10 = arith.constant 0 : index
    %11 = vector.load %arg6[%c0_9, %c0_10] : memref<1x32xf32, #tpu.memory_space<vmem>>, vector<1x32xf32>
    %12 = vector.broadcast %11 : vector<1x32xf32> to vector<8x32xf32>
    %13 = arith.addf %10, %12 : vector<8x32xf32>
    %cst_11 = arith.constant 0.000000e+00 : f32
    %14 = vector.broadcast %cst_11 : f32 to vector<8x32xf32>
    %15 = arith.maximumf %13, %14 : vector<8x32xf32>
    %16 = arith.truncf %15 : vector<8x32xf32> to vector<8x32xbf16>
    %c0_12 = arith.constant 0 : index
    %c0_13 = arith.constant 0 : index
    %17 = vector.load %arg7[%c0_12, %c0_13] : memref<32x8xbf16, #tpu.memory_space<vmem>>, vector<32x8xbf16>
    %cst_14 = arith.constant dense<0.000000e+00> : vector<8x8xf32>
    %18 = tpu.matmul %16, %17, %cst_14 {dimension_numbers = #tpu.dot_dimension_numbers<[1], [0], [0], [1], [0, 0, 1, 1], [], []>} : vector<8x32xbf16>, vector<32x8xbf16>, vector<8x8xf32> -> vector<8x8xf32>
    %c0_15 = arith.constant 0 : index
    %c0_16 = arith.constant 0 : index
    %19 = vector.load %arg8[%c0_15, %c0_16] : memref<1x8xf32, #tpu.memory_space<vmem>>, vector<1x8xf32>
    %20 = vector.broadcast %19 : vector<1x8xf32> to vector<8x8xf32>
    %21 = arith.addf %18, %20 : vector<8x8xf32>
    %c0_17 = arith.constant 0 : index
    %c0_18 = arith.constant 0 : index
    %22 = vector.load %arg9[%c0_17, %c0_18] : memref<32x8xbf16, #tpu.memory_space<vmem>>, vector<32x8xbf16>
    %cst_19 = arith.constant dense<0.000000e+00> : vector<8x8xf32>
    %23 = tpu.matmul %16, %22, %cst_19 {dimension_numbers = #tpu.dot_dimension_numbers<[1], [0], [0], [1], [0, 0, 1, 1], [], []>} : vector<8x32xbf16>, vector<32x8xbf16>, vector<8x8xf32> -> vector<8x8xf32>
    %c0_20 = arith.constant 0 : index
    %c0_21 = arith.constant 0 : index
    %24 = vector.load %arg10[%c0_20, %c0_21] : memref<1x8xf32, #tpu.memory_space<vmem>>, vector<1x8xf32>
    %25 = vector.broadcast %24 : vector<1x8xf32> to vector<8x8xf32>
    %26 = arith.addf %23, %25 : vector<8x8xf32>
    %cst_22 = arith.constant 5.000000e-01 : f32
    %27 = vector.broadcast %cst_22 : f32 to vector<8x8xf32>
    %28 = arith.mulf %27, %26 : vector<8x8xf32>
    %29 = math.exp %28 : vector<8x8xf32>
    %c0_23 = arith.constant 0 : index
    %c0_24 = arith.constant 0 : index
    %30 = vector.load %arg2[%c0_23, %c0_24] : memref<8x8xf32, #tpu.memory_space<vmem>>, vector<8x8xf32>
    %31 = arith.mulf %29, %30 : vector<8x8xf32>
    %32 = arith.addf %21, %31 : vector<8x8xf32>
    %cst_25 = arith.constant 0.000000e+00 : f32
    %33 = vector.broadcast %cst_25 : f32 to vector<8x104xf32>
    %34 = tpu.concatenate %21, %26, %32, %33 in 1 : vector<8x8xf32>, vector<8x8xf32>, vector<8x8xf32>, vector<8x104xf32> -> vector<8x128xf32>
    %c0_26 = arith.constant 0 : index
    %c0_27 = arith.constant 0 : index
    %35 = vector.load %arg17[%c0_26, %c0_27] : memref<8x128xf32, #tpu.memory_space<vmem>>, vector<8x128xf32>
    tpu.vector_store %arg17[%c0_26, %c0_27], %34 {strides = array<i32>} : memref<8x128xf32, #tpu.memory_space<vmem>>, vector<8x128xf32>,
    %36 = arith.truncf %32 : vector<8x8xf32> to vector<8x8xbf16>
    %c0_28 = arith.constant 0 : index
    %c0_29 = arith.constant 0 : index
    %37 = vector.load %arg11[%c0_28, %c0_29] : memref<8x32xbf16, #tpu.memory_space<vmem>>, vector<8x32xbf16>
    %cst_30 = arith.constant dense<0.000000e+00> : vector<8x32xf32>
    %38 = tpu.matmul %36, %37, %cst_30 {dimension_numbers = #tpu.dot_dimension_numbers<[1], [0], [0], [1], [0, 0, 1, 1], [], []>} : vector<8x8xbf16>, vector<8x32xbf16>, vector<8x32xf32> -> vector<8x32xf32>
    %c0_31 = arith.constant 0 : index
    %c0_32 = arith.constant 0 : index
    %39 = vector.load %arg12[%c0_31, %c0_32] : memref<1x32xf32, #tpu.memory_space<vmem>>, vector<1x32xf32>
    %40 = vector.broadcast %39 : vector<1x32xf32> to vector<8x32xf32>
    %41 = arith.addf %38, %40 : vector<8x32xf32>
    %cst_33 = arith.constant 0.000000e+00 : f32
    %42 = vector.broadcast %cst_33 : f32 to vector<8x32xf32>
    %43 = arith.maximumf %41, %42 : vector<8x32xf32>
    %44 = arith.truncf %43 : vector<8x32xf32> to vector<8x32xbf16>
    %c0_34 = arith.constant 0 : index
    %c0_35 = arith.constant 0 : index
    %45 = vector.load %arg13[%c0_34, %c0_35] : memref<32x32xbf16, #tpu.memory_space<vmem>>, vector<32x32xbf16>
    %cst_36 = arith.constant dense<0.000000e+00> : vector<8x32xf32>
    %46 = tpu.matmul %44, %45, %cst_36 {dimension_numbers = #tpu.dot_dimension_numbers<[1], [0], [0], [1], [0, 0, 1, 1], [], []>} : vector<8x32xbf16>, vector<32x32xbf16>, vector<8x32xf32> -> vector<8x32xf32>
    %c0_37 = arith.constant 0 : index
    %c0_38 = arith.constant 0 : index
    %47 = vector.load %arg14[%c0_37, %c0_38] : memref<1x32xf32, #tpu.memory_space<vmem>>, vector<1x32xf32>
    %48 = vector.broadcast %47 : vector<1x32xf32> to vector<8x32xf32>
    %49 = arith.addf %46, %48 : vector<8x32xf32>
    %cst_39 = arith.constant 0.000000e+00 : f32
    %50 = vector.broadcast %cst_39 : f32 to vector<8x32xf32>
    %51 = arith.maximumf %49, %50 : vector<8x32xf32>
    %52 = arith.truncf %51 : vector<8x32xf32> to vector<8x32xbf16>
    %c0_40 = arith.constant 0 : index
    %c0_41 = arith.constant 0 : index
    %53 = vector.load %arg15[%c0_40, %c0_41] : memref<32x1024xbf16, #tpu.memory_space<vmem>>, vector<32x1024xbf16>
    %cst_42 = arith.constant dense<0.000000e+00> : vector<8x1024xf32>
    %54 = tpu.matmul %52, %53, %cst_42 {dimension_numbers = #tpu.dot_dimension_numbers<[1], [0], [0], [1], [0, 0, 1, 1], [], []>} : vector<8x32xbf16>, vector<32x1024xbf16>, vector<8x1024xf32> -> vector<8x1024xf32>
    %c0_43 = arith.constant 0 : index
    %c0_44 = arith.constant 0 : index
    %55 = vector.load %arg16[%c0_43, %c0_44] : memref<1x1024xf32, #tpu.memory_space<vmem>>, vector<1x1024xf32>
    %56 = vector.broadcast %55 : vector<1x1024xf32> to vector<8x1024xf32>
    %57 = arith.addf %54, %56 : vector<8x1024xf32>
    %58 = arith.negf %57 : vector<8x1024xf32>
    %59 = math.exp %58 : vector<8x1024xf32>
    %cst_45 = arith.constant 1.000000e+00 : f32
    %60 = vector.broadcast %cst_45 : f32 to vector<8x1024xf32>
    %61 = arith.addf %60, %59 : vector<8x1024xf32>
    %62 = arith.divf %60, %61 : vector<8x1024xf32>
    %c0_46 = arith.constant 0 : index
    %c0_47 = arith.constant 0 : index
    %63 = vector.load %arg18[%c0_46, %c0_47] : memref<8x1024xf32, #tpu.memory_space<vmem>>, vector<8x1024xf32>
    tpu.vector_store %arg18[%c0_46, %c0_47], %62 {strides = array<i32>} : memref<8x1024xf32, #tpu.memory_space<vmem>>, vector<8x1024xf32>,
    return
  }
  func.func @transform_0(%arg0: i32) -> (i32, i32) {
    %c0_i32 = arith.constant 0 : i32
    %c0_i32_0 = arith.constant 0 : i32
    return %arg0, %c0_i32 : i32, i32
  }
  func.func @transform_1(%arg0: i32) -> (i32, i32) {
    %c0_i32 = arith.constant 0 : i32
    %c0_i32_0 = arith.constant 0 : i32
    return %arg0, %c0_i32 : i32, i32
  }
  func.func @transform_2(%arg0: i32) -> (i32, i32) {
    %c0_i32 = arith.constant 0 : i32
    %c0_i32_0 = arith.constant 0 : i32
    %c0_i32_1 = arith.constant 0 : i32
    return %c0_i32, %c0_i32_0 : i32, i32
  }
  func.func @transform_3(%arg0: i32) -> (i32, i32) {
    %c0_i32 = arith.constant 0 : i32
    %c0_i32_0 = arith.constant 0 : i32
    %c0_i32_1 = arith.constant 0 : i32
    return %c0_i32, %c0_i32_0 : i32, i32
  }
  func.func @transform_4(%arg0: i32) -> (i32, i32) {
    %c0_i32 = arith.constant 0 : i32
    %c0_i32_0 = arith.constant 0 : i32
    %c0_i32_1 = arith.constant 0 : i32
    return %c0_i32, %c0_i32_0 : i32, i32
  }
  func.func @transform_5(%arg0: i32) -> (i32, i32) {
    %c0_i32 = arith.constant 0 : i32
    %c0_i32_0 = arith.constant 0 : i32
    %c0_i32_1 = arith.constant 0 : i32
    return %c0_i32, %c0_i32_0 : i32, i32
  }
  func.func @transform_6(%arg0: i32) -> (i32, i32) {
    %c0_i32 = arith.constant 0 : i32
    %c0_i32_0 = arith.constant 0 : i32
    %c0_i32_1 = arith.constant 0 : i32
    return %c0_i32, %c0_i32_0 : i32, i32
  }
  func.func @transform_7(%arg0: i32) -> (i32, i32) {
    %c0_i32 = arith.constant 0 : i32
    %c0_i32_0 = arith.constant 0 : i32
    %c0_i32_1 = arith.constant 0 : i32
    return %c0_i32, %c0_i32_0 : i32, i32
  }
  func.func @transform_8(%arg0: i32) -> (i32, i32) {
    %c0_i32 = arith.constant 0 : i32
    %c0_i32_0 = arith.constant 0 : i32
    %c0_i32_1 = arith.constant 0 : i32
    return %c0_i32, %c0_i32_0 : i32, i32
  }
  func.func @transform_9(%arg0: i32) -> (i32, i32) {
    %c0_i32 = arith.constant 0 : i32
    %c0_i32_0 = arith.constant 0 : i32
    %c0_i32_1 = arith.constant 0 : i32
    return %c0_i32, %c0_i32_0 : i32, i32
  }
  func.func @transform_10(%arg0: i32) -> (i32, i32) {
    %c0_i32 = arith.constant 0 : i32
    %c0_i32_0 = arith.constant 0 : i32
    %c0_i32_1 = arith.constant 0 : i32
    return %c0_i32, %c0_i32_0 : i32, i32
  }
  func.func @transform_11(%arg0: i32) -> (i32, i32) {
    %c0_i32 = arith.constant 0 : i32
    %c0_i32_0 = arith.constant 0 : i32
    %c0_i32_1 = arith.constant 0 : i32
    return %c0_i32, %c0_i32_0 : i32, i32
  }
  func.func @transform_12(%arg0: i32) -> (i32, i32) {
    %c0_i32 = arith.constant 0 : i32
    %c0_i32_0 = arith.constant 0 : i32
    %c0_i32_1 = arith.constant 0 : i32
    return %c0_i32, %c0_i32_0 : i32, i32
  }
  func.func @transform_13(%arg0: i32) -> (i32, i32) {
    %c0_i32 = arith.constant 0 : i32
    %c0_i32_0 = arith.constant 0 : i32
    %c0_i32_1 = arith.constant 0 : i32
    return %c0_i32, %c0_i32_0 : i32, i32
  }
  func.func @transform_14(%arg0: i32) -> (i32, i32) {
    %c0_i32 = arith.constant 0 : i32
    %c0_i32_0 = arith.constant 0 : i32
    %c0_i32_1 = arith.constant 0 : i32
    return %c0_i32, %c0_i32_0 : i32, i32
  }
  func.func @transform_15(%arg0: i32) -> (i32, i32) {
    %c0_i32 = arith.constant 0 : i32
    %c0_i32_0 = arith.constant 0 : i32
    %c0_i32_1 = arith.constant 0 : i32
    return %c0_i32, %c0_i32_0 : i32, i32
  }
  func.func @transform_16(%arg0: i32) -> (i32, i32) {
    %c0_i32 = arith.constant 0 : i32
    %c0_i32_0 = arith.constant 0 : i32
    return %arg0, %c0_i32 : i32, i32
  }
  func.func @transform_17(%arg0: i32) -> (i32, i32) {
    %c0_i32 = arith.constant 0 : i32
    %c0_i32_0 = arith.constant 0 : i32
    return %arg0, %c0_i32 : i32, i32
  }
}

</mosaic_0001>

<bundles_post_ra>
// kernel: tpu_custom_call.1
= control target key start
LH: loop header
LB: loop body
LE: loop exit
PB: predicated region body
PF: predicated region fallthrough
CT: control target
= control target key end

     0   :  { %s2364_s0 = inlined_call_operand.vmem [shape: bf16[8,1024], index: 0, kind: input, shape index: {}]   ;;  %s2365_s1 = inlined_call_operand.vmem [shape: f32[8,8], index: 1, kind: input, shape index: {}]   ;;  %s2366_s2 = inlined_call_operand.vmem [shape: bf16[1024,32], index: 2, kind: input, shape index: {}]   ;;  %s2367_s3 = inlined_call_operand.vmem [shape: f32[1,32], index: 3, kind: input, shape index: {}]   ;;  %s2368_s4 = inlined_call_operand.vmem [shape: bf16[32,32], index: 4, kind: input, shape index: {}]   ;;  %s2369_s5 = inlined_call_operand.vmem [shape: f32[1,32], index: 5, kind: input, shape index: {}]   ;;  %s2370_s6 = inlined_call_operand.vmem [shape: bf16[32,8], index: 6, kind: input, shape index: {}]   ;;  %s2371_s7 = inlined_call_operand.vmem [shape: f32[1,8], index: 7, kind: input, shape index: {}]   ;;  %s2372_s8 = inlined_call_operand.vmem [shape: bf16[32,8], index: 8, kind: input, shape index: {}]   ;;  %s2373_s9 = inlined_call_operand.vmem [shape: f32[1,8], index: 9, kind: input, shape index: {}]   ;;  %s2374_s10 = inlined_call_operand.vmem [shape: bf16[8,32], index: 10, kind: input, shape index: {}]   ;;  %s2375_s11 = inlined_call_operand.vmem [shape: f32[1,32], index: 11, kind: input, shape index: {}]   ;;  %s2376_s12 = inlined_call_operand.vmem [shape: bf16[32,32], index: 12, kind: input, shape index: {}]   ;;  %s2377_s13 = inlined_call_operand.vmem [shape: f32[1,32], index: 13, kind: input, shape index: {}]   ;;  %s2378_s14 = inlined_call_operand.vmem [shape: bf16[32,1024], index: 14, kind: input, shape index: {}]   ;;  %s2379_s15 = inlined_call_operand.vmem [shape: f32[1,1024], index: 15, kind: input, shape index: {}]   ;;  %s2380_s16 = inlined_call_operand.hbm [shape: f32[8,128], index: 16, kind: output, shape index: {0}]   ;;  %s2381_s17 = inlined_call_operand.hbm [shape: f32[8,1024], index: 17, kind: output, shape index: {1}]  }
   0x1   :  { %2383 = sst [smem:[#allocation8_spill]] %s2364_s0 }
   0x2   :  { %2384 = sst [smem:[#allocation9_spill]] %s2365_s1 }
   0x3   :  { %23 = vsyncpa [#allocation3], 0  ;;  %v1771_v0 = vld [vmem:[%s2366_s2 + $0x78] sm:$0xff]   ;;  %v1775_v4 = vld [vmem:[%s2366_s2 + $0x70] sm:$0xff]   ;;  %s2385_s0 = sld [smem:[#allocation8_spill]] }
   0x4   :  { %v1772_v1 = vld [vmem:[%s2366_s2 + $0xf8] sm:$0xff]   ;;  %1624 = vmatprep.subr.bf16.mxu0 %v1771_v0  ;;  %v1776_v5 = vld [vmem:[%s2366_s2 + $0xf0] sm:$0xff]   ;;  %v1779_v8 = vld [vmem:[%s2366_s2 + $0x68] sm:$0xff]  }
   0x5   :  { %v1773_v2 = vld [vmem:[%s2366_s2 + $0x38] sm:$0xff]   ;;  %1646 = vmatprep.subr.bf16.mxu1 %v1772_v1  ;;  %v1777_v6 = vld [vmem:[%s2366_s2 + $0x30] sm:$0xff]   ;;  %v1780_v9 = vld [vmem:[%s2366_s2 + $0xe8] sm:$0xff]  }
   0x6   :  { %v1774_v3 = vld [vmem:[%s2366_s2 + $0xb8] sm:$0xff]   ;;  %1625 = vmatpush3.bf16.msra.mxu0 %v1773_v2  ;;  %v1778_v7 = vld [vmem:[%s2366_s2 + $0xb0] sm:$0xff]   ;;  %v1781_v10 = vld [vmem:[%s2366_s2 + $0x28] sm:$0xff]  }
   0x7   :  { %1647 = vmatpush3.bf16.msra.mxu1 %v1774_v3  ;;  %1626 = vmatprep.subr.bf16.mxu0 %v1775_v4  ;;  %v1782_v11 = vld [vmem:[%s2366_s2 + $0xa8] sm:$0xff]   ;;  %v1783_v12 = vld [vmem:[%s2366_s2 + $0x60] sm:$0xff]   ;;  %v1787_v16 = vld [vmem:[%s2366_s2 + $0x58] sm:$0xff]  }
   0x8   :  { %1648 = vmatprep.subr.bf16.mxu1 %v1776_v5  ;;  %v1784_v13 = vld [vmem:[%s2366_s2 + $0xe0] sm:$0xff]   ;;  %v1788_v17 = vld [vmem:[%s2366_s2 + $0xd8] sm:$0xff]   ;;  %v1791_v20 = vld [vmem:[%s2366_s2 + $0x50] sm:$0xff]  }
   0x9   :  { %v1785_v14 = vld [vmem:[%s2366_s2 + $0x20] sm:$0xff]   ;;  %v1789_v18 = vld [vmem:[%s2366_s2 + $0x18] sm:$0xff]   ;;  %v1792_v21 = vld [vmem:[%s2366_s2 + $0xd0] sm:$0xff]  }
   0xa   :  { %1627 = vmatpush3.bf16.msra.mxu0 %v1777_v6  ;;  %v1786_v15 = vld [vmem:[%s2366_s2 + $0xa0] sm:$0xff]   ;;  %v1790_v19 = vld [vmem:[%s2366_s2 + $0x98] sm:$0xff]   ;;  %v1793_v22 = vld [vmem:[%s2366_s2 + $0x10] sm:$0xff]  }
   0xb   :  { %1649 = vmatpush3.bf16.msra.mxu1 %v1778_v7  ;;  %1628 = vmatprep.subr.bf16.mxu0 %v1779_v8  ;;  %v1794_v23 = vld [vmem:[%s2366_s2 + $0x90] sm:$0xff]   ;;  %v1795_v24 = vld [vmem:[%s2366_s2 + $0x48] sm:$0xff]   ;;  %v1799_v28 = vld [vmem:[%s2366_s2 + $0x40] sm:$0xff]  }
   0xc   :  { %1650 = vmatprep.subr.bf16.mxu1 %v1780_v9  ;;  %v1796_v25 = vld [vmem:[%s2366_s2 + $0xc8] sm:$0xff]   ;;  %v1800_v29 = vld [vmem:[%s2366_s2 + $0xc0] sm:$0xff]   ;;  %v1807_v38 = vld [vmem:[%s2366_s2 + $0x178] sm:$0xff]  }
   0xd   :  { %v1797_v26 = vld [vmem:[%s2366_s2 + $0x8] sm:$0xff]   ;;  %v1801_v30 = vld [vmem:[%s2366_s2] sm:$0xff]   ;;  %v1808_v39 = vld [vmem:[%s2366_s2 + $0x1f8] sm:$0xff]  }
   0xe   :  { %1629 = vmatpush3.bf16.msra.mxu0 %v1781_v10  ;;  %v1798_v27 = vld [vmem:[%s2366_s2 + $0x88] sm:$0xff]   ;;  %v1802_v31 = vld [vmem:[%s2366_s2 + $0x80] sm:$0xff]   ;;  %v1809_v40 = vld [vmem:[%s2366_s2 + $0x138] sm:$0xff]  }
   0xf   :  { %1651 = vmatpush3.bf16.msra.mxu1 %v1782_v11  ;;  %1630 = vmatprep.subr.bf16.mxu0 %v1783_v12  ;;  %v58_v32 = vld [vmem:[%s2385_s0] sm:$0xff]  ;;  %v59_v33 = vld [vmem:[%s2385_s0 + $0x8] sm:$0xff]  ;;  %v1810_v41 = vld [vmem:[%s2366_s2 + $0x1b8] sm:$0xff]  }
  0x10   :  { %1652 = vmatprep.subr.bf16.mxu1 %v1784_v13  ;;  %v1506_v34 = vcombine.low %v58_v32, %v58_v32  ;;  %v1507_v35 = vcombine.high %v58_v32, %v58_v32  ;;  %v1508_v36 = vcombine.low %v59_v33, %v59_v33  ;;  %v1509_v37 = vcombine.high %v59_v33, %v59_v33  ;;  %v1811_v42 = vld [vmem:[%s2366_s2 + $0x170] sm:$0xff]   ;;  %v1815_v46 = vld [vmem:[%s2366_s2 + $0x168] sm:$0xff]   ;;  %v1819_v50 = vld [vmem:[%s2366_s2 + $0x160] sm:$0xff]  }
  0x11   :  { %v1812_v43 = vld [vmem:[%s2366_s2 + $0x1f0] sm:$0xff]   ;;  %v1816_v47 = vld [vmem:[%s2366_s2 + $0x1e8] sm:$0xff]   ;;  %v1820_v51 = vld [vmem:[%s2366_s2 + $0x1e0] sm:$0xff]  }
  0x12   :  { %1631 = vmatpush3.bf16.msra.mxu0 %v1785_v14  ;;  %641 = vmatprep.mubr.bf16.mxu0 %v1507_v35  ;;  %v1813_v44 = vld [vmem:[%s2366_s2 + $0x130] sm:$0xff]   ;;  %v1817_v48 = vld [vmem:[%s2366_s2 + $0x128] sm:$0xff]   ;;  %v1821_v52 = vld [vmem:[%s2366_s2 + $0x120] sm:$0xff]  }
  0x13   :  { %1653 = vmatpush3.bf16.msra.mxu1 %v1786_v15  ;;  %1632 = vmatprep.subr.bf16.mxu0 %v1787_v16  ;;  %v1814_v45 = vld [vmem:[%s2366_s2 + $0x1b0] sm:$0xff]   ;;  %v1818_v49 = vld [vmem:[%s2366_s2 + $0x1a8] sm:$0xff]   ;;  %v1822_v53 = vld [vmem:[%s2366_s2 + $0x1a0] sm:$0xff]  }
  0x14   :  { %1654 = vmatprep.subr.bf16.mxu1 %v1788_v17  ;;  %681 = vmatprep.mubr.bf16.mxu1 %v1509_v37  ;;  %v1823_v54 = vld [vmem:[%s2366_s2 + $0x158] sm:$0xff]   ;;  %v1827_v58 = vld [vmem:[%s2366_s2 + $0x150] sm:$0xff]   ;;  %v1831_v62 = vld [vmem:[%s2366_s2 + $0x148] sm:$0xff]  }
  0x15   :  { %v1824_v55 = vld [vmem:[%s2366_s2 + $0x1d8] sm:$0xff]   ;;  %v1828_v59 = vld [vmem:[%s2366_s2 + $0x1d0] sm:$0xff]   ;;  %v1832_v63 = vld [vmem:[%s2366_s2 + $0x1c8] sm:$0xff]  }
  0x16   :  { %1633 = vmatpush3.bf16.msra.mxu0 %v1789_v18  ;;  %v1825_v56 = vld [vmem:[%s2366_s2 + $0x118] sm:$0xff]   ;;  %v1829_v60 = vld [vmem:[%s2366_s2 + $0x110] sm:$0xff]   ;;  %v1833_v0 = vld [vmem:[%s2366_s2 + $0x108] sm:$0xff]  }
  0x17   :  { %1655 = vmatpush3.bf16.msra.mxu1 %v1790_v19  ;;  %1634 = vmatprep.subr.bf16.mxu0 %v1791_v20  ;;  %v1826_v57 = vld [vmem:[%s2366_s2 + $0x198] sm:$0xff]   ;;  %v1830_v61 = vld [vmem:[%s2366_s2 + $0x190] sm:$0xff]   ;;  %v1834_v1 = vld [vmem:[%s2366_s2 + $0x188] sm:$0xff]  }
  0x18   :  { %1656 = vmatprep.subr.bf16.mxu1 %v1792_v21  ;;  %v1835_v2 = vld [vmem:[%s2366_s2 + $0x140] sm:$0xff]   ;;  %v60_v6 = vld [vmem:[%s2385_s0 + $0x10] sm:$0xff]  ;;  %v61_v9 = vld [vmem:[%s2385_s0 + $0x18] sm:$0xff] }
  0x19   :  { %v1836_v3 = vld [vmem:[%s2366_s2 + $0x1c0] sm:$0xff]   ;;  %v1510_v7 = vcombine.low %v60_v6, %v60_v6  ;;  %v1511_v8 = vcombine.high %v60_v6, %v60_v6  ;;  %v1512_v10 = vcombine.low %v61_v9, %v61_v9  ;;  %v1513_v11 = vcombine.high %v61_v9, %v61_v9 }
  0x1a   :  { %1635 = vmatpush3.bf16.msra.mxu0 %v1793_v22  ;;  %v1837_v4 = vld [vmem:[%s2366_s2 + $0x100] sm:$0xff]  }
  0x1b   :  { %1657 = vmatpush3.bf16.msra.mxu1 %v1794_v23  ;;  %1636 = vmatprep.subr.bf16.mxu0 %v1795_v24  ;;  %v1838_v5 = vld [vmem:[%s2366_s2 + $0x180] sm:$0xff]  }
  0x1c   :  { %1658 = vmatprep.subr.bf16.mxu1 %v1796_v25 }
  0x1e   :  { %1637 = vmatpush3.bf16.msra.mxu0 %v1797_v26 }
  0x1f   :  { %1659 = vmatpush3.bf16.msra.mxu1 %v1798_v27  ;;  %1638 = vmatprep.subr.bf16.mxu0 %v1799_v28 }
  0x20   :  { %1660 = vmatprep.subr.bf16.mxu1 %v1800_v29 }
  0x22   :  { %1639 = vmatpush3.bf16.msra.mxu0 %v1801_v30 }
  0x23   :  { %1661 = vmatpush3.bf16.msra.mxu1 %v1802_v31  ;;  %1668 = vmatprep.subr.bf16.mxu0 %v1807_v38 }
  0x24   :  { %1690 = vmatprep.subr.bf16.mxu1 %v1808_v39 }
  0x25   :  { %642 = vmatmul.mubr.bf16.vlgmr.msra.gmra.mxu0 %v1506_v34 }
  0x26   :  { %682 = vmatmul.mubr.bf16.vlgmr.msra.gmra.mxu1 %v1508_v36  ;;  %1669 = vmatpush3.bf16.msra.mxu0 %v1809_v40 }
  0x27   :  { %1691 = vmatpush3.bf16.msra.mxu1 %v1810_v41  ;;  %1670 = vmatprep.subr.bf16.mxu0 %v1811_v42 }
  0x28   :  { %1692 = vmatprep.subr.bf16.mxu1 %v1812_v43  ;;  %721 = vmatprep.mubr.bf16.mxu0 %v1511_v8 }
  0x29   :  { %761 = vmatprep.mubr.bf16.mxu1 %v1513_v11 }
  0x2a   :  { %1671 = vmatpush3.bf16.msra.mxu0 %v1813_v44 }
  0x2b   :  { %1693 = vmatpush3.bf16.msra.mxu1 %v1814_v45  ;;  %1672 = vmatprep.subr.bf16.mxu0 %v1815_v46 }
  0x2c   :  { %1694 = vmatprep.subr.bf16.mxu1 %v1816_v47 }
  0x2e   :  { %1673 = vmatpush3.bf16.msra.mxu0 %v1817_v48 }
  0x2f   :  { %1695 = vmatpush3.bf16.msra.mxu1 %v1818_v49  ;;  %1674 = vmatprep.subr.bf16.mxu0 %v1819_v50 }
  0x30   :  { %1696 = vmatprep.subr.bf16.mxu1 %v1820_v51 }
  0x32   :  { %1675 = vmatpush3.bf16.msra.mxu0 %v1821_v52 }
  0x33   :  { %1697 = vmatpush3.bf16.msra.mxu1 %v1822_v53  ;;  %1676 = vmatprep.subr.bf16.mxu0 %v1823_v54 }
  0x34   :  { %1698 = vmatprep.subr.bf16.mxu1 %v1824_v55 }
  0x36   :  { %1677 = vmatpush3.bf16.msra.mxu0 %v1825_v56 }
  0x37   :  { %1699 = vmatpush3.bf16.msra.mxu1 %v1826_v57  ;;  %1678 = vmatprep.subr.bf16.mxu0 %v1827_v58 }
  0x38   :  { %1700 = vmatprep.subr.bf16.mxu1 %v1828_v59 }
  0x3a   :  { %1679 = vmatpush3.bf16.msra.mxu0 %v1829_v60 }
  0x3b   :  { %1701 = vmatpush3.bf16.msra.mxu1 %v1830_v61  ;;  %1680 = vmatprep.subr.bf16.mxu0 %v1831_v62 }
  0x3c   :  { %1702 = vmatprep.subr.bf16.mxu1 %v1832_v63 }
  0x3e   :  { %1681 = vmatpush3.bf16.msra.mxu0 %v1833_v0 }
  0x3f   :  { %1703 = vmatpush3.bf16.msra.mxu1 %v1834_v1  ;;  %1682 = vmatprep.subr.bf16.mxu0 %v1835_v2 }
  0x40   :  { %1704 = vmatprep.subr.bf16.mxu1 %v1836_v3 }
  0x42   :  { %1683 = vmatpush3.bf16.msra.mxu0 %v1837_v4 }
  0x43   :  { %1705 = vmatpush3.bf16.msra.mxu1 %v1838_v5 }
  0x45   :  { %722 = vmatmul.mubr.bf16.vlgmr.msra.gmra.mxu0 %v1510_v7 }
  0x46   :  { %762 = vmatmul.mubr.bf16.vlgmr.msra.gmra.mxu1 %v1512_v10 }
  0x47   :  { %24 = vsyncpa [#allocation5], 0  ;;  %v1843_v12 = vld [vmem:[%s2368_s4 + $0x8] sm:$0xff]   ;;  %v1929_v13 = vmov 0.0   ;;  %v1844_v14 = vld [vmem:[%s2368_s4] sm:$0xff]   ;;  %vm1930_vm0 = vmmov 0  }
  0x48   :  { %1726 = vmatprep.subr.bf16.mxu0 %v1929_v13  ;;  %1734 = vmatprep.subr.bf16.mxu1 %v1929_v13  ;;  %v1505_v24 = vld [vmem:[%s2367_s3] ss:$0 sm:$0xff]  ;;  %vm794_vm1 = vcmask 261120   ;;  %v1845_v41 = vld [vmem:[%s2372_s8 + $0x8] sm:$0xff]   ;;  %vm1002_vm2 = vcmask 1043456   ;;  %s1931_s29 = smov 8  }
  0x49   :  { %1727 = vmatpush3.bf16.msra.mxu0 %v1843_v12  ;;  %1730 = vmatprep.mubr.msk.bf16.mxu0 %vm1930_vm0, %v1929_v13  ;;  %v1846_v43 = vld [vmem:[%s2370_s6 + $0x8] sm:$0xff]   ;;  %v1847_v44 = vld [vmem:[%s2372_s8] sm:$0xff]   ;;  %s2386_s4 = sld [smem:[#allocation9_spill]]  ;;  %vm983_vm3 = vcmask 64512   ;;  %s1932_s19 = smov 16   ;;  %vm985_vm4 = vcmask 130048  }
  0x4a   :  { %1728 = vmatprep.subr.bf16.mxu0 %v1929_v13  ;;  %1738 = vmatprep.mubr.msk.bf16.mxu1 %vm1930_vm0, %v1929_v13  ;;  %v1848_v45 = vld [vmem:[%s2370_s6] sm:$0xff]   ;;  %v1849_v4 = vld [vmem:[%s2376_s12 + $0x8] sm:$0xff]   ;;  %vm987_vm5 = vcmask 195584  }
  0x4b   :  { %1735 = vmatpush3.bf16.msra.mxu1 %v1846_v43  ;;  %v1578_v46 = vld [vmem:[%s2369_s5] ss:$0 sm:$0xff]  ;;  %v1130_v43 = vld [vmem:[%s2378_s14 + $0x70] sm:$0xff] }
  0x4c   :  { %1736 = vmatprep.subr.bf16.mxu1 %v1929_v13  ;;  %v991_v54 = vld [vmem:[%s2374_s10] sm:$0xf] }
  0x4d   :  { %1729 = vmatpush3.bf16.msra.mxu0 %v1844_v14  ;;  %v1004_v55 = vsel %vm1002_vm2, %v991_v54, 0  ;;  %v1586_v56 = vld [vmem:[%s2373_s9] ss:$0 sm:$0xff]  ;;  %v1118_v54 = vld [vmem:[%s2378_s14 + $0x10] sm:$0xff] }
  0x4e   :  { %1742 = vmatprep.subr.bf16.mxu0 %v1929_v13  ;;  %v1582_v5 = vld [vmem:[%s2371_s7] ss:$0 sm:$0xff] }
  0x4f   :  { %1737 = vmatpush3.bf16.msra.mxu1 %v1848_v45  ;;  %v972_v6 = vld [vmem:[%s2386_s4] sm:$0xff] }
  0x50   :  { %1750 = vmatprep.subr.bf16.mxu1 %v1929_v13  ;;  %v1850_v12 = vld [vmem:[%s2376_s12] sm:$0xff]  }
  0x51   :  { %v1128_v14 = vld [vmem:[%s2378_s14 + $0x60] sm:$0xff] }
  0xe5   :  { %v1640_v15 = vpop.f32.mrf.mxu0 }
  0xe6   :  { %v1662_v16 = vpop.f32.mrf.mxu1 }
  0xe7   :  { %v1641_v17 = vpop.f32.mrf.mxu0 }
  0xe8   :  { %v1663_v18 = vpop.f32.mrf.mxu1  ;;  %v1642_v23 = vadd.f32 %v1641_v17, %v1640_v15  ;;  %v1125_v15 = vld [vmem:[%s2378_s14 + $0x48] sm:$0xff] }
  0xe9   :  { %v1643_v19 = vpop.f32.mrf.mxu0  ;;  %v1664_v26 = vadd.f32 %v1663_v18, %v1662_v16  ;;  %v1129_v18 = vld [vmem:[%s2378_s14 + $0x68] sm:$0xff] }
  0xea   :  { %v1665_v20 = vpop.f32.mrf.mxu1  ;;  %v644_v25 = vadd.f32 %v1642_v23, %v1505_v24  ;;  %v1606_v19 = vcombine.low %v1125_v15, %v1129_v18 }
  0xeb   :  { %v1644_v21 = vpop.f32.mrf.mxu0  ;;  %v1607_v20 = vcombine.high %v1125_v15, %v1129_v18 }
  0xec   :  { %v1666_v22 = vpop.f32.mrf.mxu1  ;;  %v684_v31 = vadd.f32 %v1664_v26, %v644_v25  ;;  %v1590_v26 = vld [vmem:[%s2375_s11] ss:$0 sm:$0xff] }
 0x105   :  { %v1684_v27 = vpop.f32.mrf.mxu0 }
 0x106   :  { %v1706_v28 = vpop.f32.mrf.mxu1 }
 0x107   :  { %v1685_v29 = vpop.f32.mrf.mxu0 }
 0x108   :  { %v1707_v30 = vpop.f32.mrf.mxu1  ;;  %v1686_v32 = vadd.f32 %v1685_v29, %v1684_v27 }
 0x109   :  { %v1687_v33 = vpop.f32.mrf.mxu0  ;;  %v1708_v36 = vadd.f32 %v1707_v30, %v1706_v28 }
 0x10a   :  { %v1709_v34 = vpop.f32.mrf.mxu1  ;;  %v724_v35 = vadd.f32 %v1686_v32, %v684_v31 }
 0x10b   :  { %v1688_v37 = vpop.f32.mrf.mxu0  ;;  %v1116_v34 = vld [vmem:[%s2378_s14] sm:$0xff] }
 0x10c   :  { %v1710_v38 = vpop.f32.mrf.mxu1  ;;  %v764_v39 = vadd.f32 %v1708_v36, %v724_v35  ;;  %v1120_v35 = vld [vmem:[%s2378_s14 + $0x20] sm:$0xff]  ;;  %v1117_v36 = vld [vmem:[%s2378_s14 + $0x8] sm:$0xff] }
 0x10d   :  { %v1597_v37 = vcombine.high %v1116_v34, %v1120_v35  ;;  %v1121_v38 = vld [vmem:[%s2378_s14 + $0x28] sm:$0xff] }
 0x10e   :  { %v769_v40 = vmax.f32 %v764_v39, 0.0  ;;  %v1596_v39 = vcombine.low %v1116_v34, %v1120_v35 }
 0x110   :  { %v770_v42 = vpack.c.bf16 %v769_v40, %v769_v40  ;;  %v1598_v40 = vcombine.low %v1117_v36, %v1121_v38 }
 0x112   :  { %1731 = vmatmul.mubr.msk.bf16.vlgmr.msra.gmra.mxu0 %vm794_vm1, %v770_v42  ;;  %v1126_v42 = vld [vmem:[%s2378_s14 + $0x50] sm:$0xff] }
 0x113   :  { %1743 = vmatpush3.bf16.msra.mxu0 %v1845_v41  ;;  %1746 = vmatprep.mubr.msk.bf16.mxu0 %vm1930_vm0, %v1929_v13  ;;  %v1599_v41 = vcombine.high %v1117_v36, %v1121_v38  ;;  %v1609_v45 = vcombine.high %v1126_v42, %v1130_v43 }
 0x114   :  { %1744 = vmatprep.subr.bf16.mxu0 %v1929_v13 }
 0x117   :  { %1745 = vmatpush3.bf16.msra.mxu0 %v1847_v44  ;;  %v1127_v44 = vld [vmem:[%s2378_s14 + $0x58] sm:$0xff] }
 0x118   :  { %1756 = vmatprep.subr.bf16.mxu0 %v1929_v13 }
 0x1d2   :  { %v832_v47 = vpop.f32.mrf.mxu0 }
 0x1d3   :  { %v833_v48 = vadd.f32 %v1578_v46, %v832_v47  ;;  %v1131_v46 = vld [vmem:[%s2378_s14 + $0x78] sm:$0xff]  ;;  %v1933_v47 = vmov 0  }
 0x1d4   :  { %v1732_v49 = vpop.f32.mrf.mxu0 }
 0x1d5   :  { %v838_v50 = vmax.f32 %v833_v48, 0.0  ;;  %v1608_v48 = vcombine.low %v1126_v42, %v1130_v43  ;;  %v1610_v49 = vcombine.low %v1127_v44, %v1131_v46 }
 0x1d6   :  { %v835_v51 = vpop.f32.mrf.mxu0 }
 0x1d7   :  { %v839_v52 = vpack.c.bf16 %v838_v50, %v838_v50  ;;  %v1611_v50 = vcombine.high %v1127_v44, %v1131_v46  ;;  %v1592_v51 = vld [vmem:[%s2377_s13] ss:$0 sm:$0xff]  ;;  %s1934_s13 = smov [#allocation2]  }
 0x1d8   :  { %v1733_v53 = vpop.f32.mrf.mxu0 }
 0x1d9   :  { %1739 = vmatmul.mubr.msk.bf16.vlgmr.msra.gmra.mxu1 %vm794_vm1, %v839_v52  ;;  %1747 = vmatmul.mubr.msk.bf16.vlgmr.msra.gmra.mxu0 %vm794_vm1, %v839_v52 }
 0x1da   :  { %1752 = vmatprep.mubr.msk.bf16.mxu1 %vm1930_vm0, %v1929_v13  ;;  %1760 = vmatprep.mubr.msk.bf16.mxu0 %vm1930_vm0, %v1929_v13 }
 0x1db   :  { %1751 = vmatpush3.bf16.msra.mxu1 %v1004_v55  ;;  %1757 = vmatpush3.bf16.msra.mxu0 %v1849_v4 }
 0x1dc   :  { %1758 = vmatprep.subr.bf16.mxu0 %v1929_v13  ;;  %v1124_v13 = vld [vmem:[%s2378_s14 + $0x40] sm:$0xff] }
 0x1dd   :  { %v1604_v16 = vcombine.low %v1124_v13, %v1128_v14  ;;  %v1605_v17 = vcombine.high %v1124_v13, %v1128_v14 }
 0x1df   :  { %1759 = vmatpush3.bf16.msra.mxu0 %v1850_v12  ;;  %1269 = vmatprep.subr.bf16.mxu1 %v1605_v17 }
 0x1e0   :  { %1310 = vmatprep.subr.bf16.mxu0 %v1607_v20 }
 0x299   :  { %v900_v57 = vpop.f32.mrf.mxu1  ;;  %v963_v58 = vpop.f32.mrf.mxu0 }
 0x29a   :  { %v964_v59 = vadd.f32 %v1586_v56, %v963_v58  ;;  %v901_v8 = vadd.f32 %v1582_v5, %v900_v57  ;;  %v1122_v56 = vld [vmem:[%s2378_s14 + $0x30] sm:$0xff]  ;;  %v1119_v57 = vld [vmem:[%s2378_s14 + $0x18] sm:$0xff] }
 0x29b   :  { %v1740_v60 = vpop.f32.mrf.mxu1  ;;  %v1748_v61 = vpop.f32.mrf.mxu0  ;;  %v1123_v58 = vld [vmem:[%s2378_s14 + $0x38] sm:$0xff]  ;;  %s1483_s14 = sshll.u32 %s1934_s13, 4  ;;  %s1484_s14 = int_to_ptr.vmem [resolvable:$true] %s1483_s14 }
 0x29c   :  { %v969_v62 = vmul.f32 0.5, %v964_v59  ;;  %976 = vrot.lane.b32.xlu0 %v964_v59, %s1931_s29  ;;  %s1885_s6 = scalar_lea.vmem %s1484_s14, 128  ;;  %p1890_p1 = scmp.lt.s32.totalorder %s1484_s14, %s1484_s14 }
 0x29d   :  { %v903_v63 = vpop.f32.mrf.mxu1  ;;  %v966_v0 = vpop.f32.mrf.mxu0  ;;  %p1886_p0 = scmp.ne.s32.totalorder %s1484_s14, %s1885_s6  ;;  %p1891_p2 = scmp.lt.s32.totalorder %s1885_s6, %s1885_s6 }
 0x29e   :  { %v970_v1 = vmul.f32 1.442695, %v969_v62  ;;  %v1601_v62 = vcombine.high %v1118_v54, %v1122_v56  ;;  %v1603_v63 = vcombine.high %v1119_v57, %v1123_v58 }
 0x29f   :  { %v1741_v2 = vpop.f32.mrf.mxu1  ;;  %v1749_v3 = vpop.f32.mrf.mxu0  ;;  %p1892_p3 = por %p1891_p2, %p1890_p1 }
 0x2a0   :  { %1851 = vpow2.f32 %v970_v1  ;;  %v1600_v1 = vcombine.low %v1118_v54, %v1122_v56  ;;  %v1602_v2 = vcombine.low %v1119_v57, %v1123_v58 }
 0x2a1   :  { %p1893_p4 = pnand %p1892_p3, %p1886_p0 }
 0x2ad   :  { %v1852_v7 = vpop.eup %1851 }
 0x2ae   :  { %v973_v9 = vmul.f32 %v1852_v7, %v972_v6 }
 0x2b0   :  { %v974_v10 = vadd.f32 %v973_v9, %v901_v8 }
 0x2b2   :  { %980 = vrot.lane.b32.xlu0 %v974_v10, %s1932_s19  ;;  %v990_v11 = vpack.c.bf16 %v974_v10, %v974_v10 }
 0x2b4   :  { %1753 = vmatmul.mubr.msk.bf16.vlgmr.msra.gmra.mxu1 %vm983_vm3, %v990_v11 }
 0x2b5   :  { %1270 = vmatpush1.bf16.msra.mxu1 %v1604_v16  ;;  %1289 = vmatprep.mubr.bf16.mxu1 %v1933_v47 }
 0x2b6   :  { %1271 = vmatprep.subr.bf16.mxu1 %v1597_v37 }
 0x2b9   :  { %1272 = vmatpush1.bf16.msra.mxu1 %v1596_v39 }
 0x2ba   :  { %1351 = vmatprep.subr.bf16.mxu1 %v1609_v45 }
 0x30e   :  { %v977_v21 = vpop.permute.xlu0 %976 }
 0x30f   :  { %v984_v22 = vsel %vm983_vm3, %v901_v8, %v977_v21 }
 0x324   :  { %v981_v23 = vpop.permute.xlu0 %980 }
 0x325   :  { %v986_v24 = vsel %vm985_vm4, %v984_v22, %v981_v23 }
 0x326   :  { %v988_v25 = vsel %vm987_vm5, %v986_v24, 0.0 }
 0x327   :  { %989 = vst [vmem:[#allocation2] sm:$0xff] %v988_v25 }
 0x374   :  { %v1040_v27 = vpop.f32.mrf.mxu1 }
 0x375   :  { %v1041_v28 = vadd.f32 %v1590_v26, %v1040_v27 }
 0x376   :  { %v1754_v29 = vpop.f32.mrf.mxu1 }
 0x377   :  { %v1046_v30 = vmax.f32 %v1041_v28, 0.0 }
 0x378   :  { %v1043_v31 = vpop.f32.mrf.mxu1 }
 0x379   :  { %v1047_v32 = vpack.c.bf16 %v1046_v30, %v1046_v30 }
 0x37a   :  { %v1755_v33 = vpop.f32.mrf.mxu1 }
 0x37b   :  { %1761 = vmatmul.mubr.msk.bf16.vlgmr.msra.gmra.mxu0 %vm794_vm1, %v1047_v32 }
 0x37c   :  { %1311 = vmatpush1.bf16.msra.mxu0 %v1606_v19  ;;  %1330 = vmatprep.mubr.bf16.mxu0 %v1933_v47 }
 0x37d   :  { %1312 = vmatprep.subr.bf16.mxu0 %v1599_v41 }
 0x380   :  { %1313 = vmatpush1.bf16.msra.mxu0 %v1598_v40 }
 0x381   :  { %1392 = vmatprep.subr.bf16.mxu0 %v1611_v50 }
 0x43b   :  { %v1108_v52 = vpop.f32.mrf.mxu0 }
 0x43c   :  { %v1109_v53 = vadd.f32 %v1592_v51, %v1108_v52 }
 0x43d   :  { %v1762_v55 = vpop.f32.mrf.mxu0 }
 0x43e   :  { %v1114_v59 = vmax.f32 %v1109_v53, 0.0 }
 0x43f   :  { %v1111_v60 = vpop.f32.mrf.mxu0 }
 0x440   :  { %v1115_v61 = vpack.c.bf16 %v1114_v59, %v1114_v59 }
 0x441   :  { %v1763_v0 = vpop.f32.mrf.mxu0 }
 0x442   :  { %1612 = vmatmul.mubr.msk.bf16.vlgmr.msra.gmra.mxu1 %vm794_vm1, %v1115_v61  ;;  %1613 = vmatmul.mubr.msk.bf16.vlgmr.msra.gmra.mxu0 %vm794_vm1, %v1115_v61 }
 0x443   :  { %1352 = vmatpush1.bf16.msra.mxu1 %v1608_v48  ;;  %1393 = vmatpush1.bf16.msra.mxu0 %v1610_v49 }
 0x444   :  { %1353 = vmatprep.subr.bf16.mxu1 %v1601_v62  ;;  %1394 = vmatprep.subr.bf16.mxu0 %v1603_v63 }
 0x445   :  { %1371 = vmatprep.mubr.bf16.mxu1 %v1933_v47  ;;  %1412 = vmatprep.mubr.bf16.mxu0 %v1933_v47 }
 0x447   :  { %1354 = vmatpush1.bf16.msra.mxu1 %v1600_v1  ;;  %1395 = vmatpush1.bf16.msra.mxu0 %v1602_v2 }
 0x44a   :  { %1614 = vmatmul.mubr.msk.bf16.vlgmr.msra.gmra.mxu1 %vm794_vm1, %v1115_v61  ;;  %1615 = vmatmul.mubr.msk.bf16.vlgmr.msra.gmra.mxu0 %vm794_vm1, %v1115_v61 }
 0x44b   :  { %1896 = shalt.err (!%p1893_p4)
}
 0x44c   :  { %1486 = dma.vmem_to_hbm [thread:$0]  %s1484_s14, 128, %s2380_s16, [#allocation3]   ;;  %v1134_v3 = vlaneseq  ;;  %v1132_v7 = vld [vmem:[%s2379_s15] sm:$0xff] }
 0x44d   :  { %s1935_s15 = smov [#allocation4]  }
 0x44e   :  { %v1135_v4 = vshrl.u32 %v1134_v3, 7  ;;  %s1493_s16 = sshll.u32 %s1935_s15, 4  ;;  %s1494_s16 = int_to_ptr.vmem [resolvable:$true] %s1493_s16 }
 0x44f   :  { %s1905_s11 = scalar_lea.vmem %s1494_s16, 1024  ;;  %p1910_p6 = scmp.lt.s32.totalorder %s1494_s16, %s1494_s16 }
 0x450   :  { %v1136_v5 = vsub.s32 0, %v1135_v4  ;;  %v1144_v6 = vsub.s32 2, %v1135_v4  ;;  %v1140_v8 = vsub.s32 1, %v1135_v4  ;;  %v1148_v9 = vsub.s32 3, %v1135_v4  ;;  %p1906_p5 = scmp.ne.s32.totalorder %s1494_s16, %s1905_s11  ;;  %p1911_p7 = scmp.lt.s32.totalorder %s1905_s11, %s1905_s11 }
 0x451   :  { %v1152_v16 = vsub.s32 4, %v1135_v4  ;;  %v1160_v19 = vsub.s32 6, %v1135_v4  ;;  %v1156_v22 = vsub.s32 5, %v1135_v4  ;;  %v1164_v23 = vsub.s32 7, %v1135_v4 }
 0x452   :  { %v1137_v10 = vrot.slane %v1132_v7, %v1136_v5  ;;  %v1145_v11 = vrot.slane %v1132_v7, %v1144_v6  ;;  %v1141_v12 = vrot.slane %v1132_v7, %v1140_v8  ;;  %v1149_v13 = vrot.slane %v1132_v7, %v1148_v9  ;;  %p1912_p8 = por %p1911_p7, %p1910_p6 }
 0x453   :  { %v1153_v30 = vrot.slane %v1132_v7, %v1152_v16  ;;  %v1161_v33 = vrot.slane %v1132_v7, %v1160_v19  ;;  %v1157_v36 = vrot.slane %v1132_v7, %v1156_v22  ;;  %v1165_v37 = vrot.slane %v1132_v7, %v1164_v23 }
 0x454   :  { %p1913_p9 = pnand %p1912_p8, %p1906_p5 }
 0x502   :  { %v1291_v14 = vpop.f32.mrf.mxu1  ;;  %v1332_v15 = vpop.f32.mrf.mxu0 }
 0x503   :  { %v1292_v17 = vadd.f32 %v1291_v14, %v1137_v10  ;;  %v1333_v18 = vadd.f32 %v1332_v15, %v1145_v11 }
 0x504   :  { %v1293_v20 = vpop.f32.mrf.mxu1  ;;  %v1334_v21 = vpop.f32.mrf.mxu0 }
 0x505   :  { %v1616_v24 = vmul.f32 -1.442695, %v1292_v17  ;;  %v1618_v25 = vmul.f32 -1.442695, %v1333_v18  ;;  %v1294_v26 = vadd.f32 %v1293_v20, %v1141_v12  ;;  %v1335_v27 = vadd.f32 %v1334_v21, %v1149_v13 }
 0x506   :  { %v1295_v28 = vpop.f32.mrf.mxu1  ;;  %v1336_v29 = vpop.f32.mrf.mxu0 }
 0x507   :  { %1853 = vpow2.f32 %v1616_v24  ;;  %v1617_v31 = vmul.f32 -1.442695, %v1294_v26  ;;  %v1619_v32 = vmul.f32 -1.442695, %v1335_v27 }
 0x508   :  { %1855 = vpow2.f32 %v1618_v25  ;;  %v1296_v34 = vpop.f32.mrf.mxu1  ;;  %v1337_v35 = vpop.f32.mrf.mxu0 }
 0x509   :  { %1857 = vpow2.f32 %v1617_v31 }
 0x50a   :  { %1859 = vpow2.f32 %v1619_v32  ;;  %v1373_v38 = vpop.f32.mrf.mxu1  ;;  %v1414_v39 = vpop.f32.mrf.mxu0 }
 0x50b   :  { %v1374_v40 = vadd.f32 %v1373_v38, %v1153_v30  ;;  %v1415_v41 = vadd.f32 %v1414_v39, %v1161_v33 }
 0x50c   :  { %v1375_v42 = vpop.f32.mrf.mxu1  ;;  %v1416_v43 = vpop.f32.mrf.mxu0 }
 0x50d   :  { %v1620_v44 = vmul.f32 -1.442695, %v1374_v40  ;;  %v1622_v45 = vmul.f32 -1.442695, %v1415_v41  ;;  %v1376_v46 = vadd.f32 %v1375_v42, %v1157_v36  ;;  %v1417_v47 = vadd.f32 %v1416_v43, %v1165_v37 }
 0x50e   :  { %v1377_v48 = vpop.f32.mrf.mxu1  ;;  %v1418_v49 = vpop.f32.mrf.mxu0 }
 0x50f   :  { %1861 = vpow2.f32 %v1620_v44  ;;  %v1621_v50 = vmul.f32 -1.442695, %v1376_v46  ;;  %v1623_v51 = vmul.f32 -1.442695, %v1417_v47 }
 0x510   :  { %1863 = vpow2.f32 %v1622_v45  ;;  %v1378_v52 = vpop.f32.mrf.mxu1  ;;  %v1419_v53 = vpop.f32.mrf.mxu0 }
 0x511   :  { %1865 = vpow2.f32 %v1621_v50 }
 0x512   :  { %1867 = vpow2.f32 %v1623_v51 }
 0x514   :  { %v1854_v54 = vpop.eup %1853 }
 0x515   :  { %v1856_v55 = vpop.eup %1855  ;;  %v1445_v56 = vadd.f32 1.0, %v1854_v54 }
 0x516   :  { %v1858_v57 = vpop.eup %1857  ;;  %v1447_v58 = vadd.f32 1.0, %v1856_v55 }
 0x517   :  { %v1860_v59 = vpop.eup %1859  ;;  %1869 = vrcp.f32 %v1445_v56  ;;  %v1446_v60 = vadd.f32 1.0, %v1858_v57 }
 0x518   :  { %1871 = vrcp.f32 %v1447_v58  ;;  %v1448_v61 = vadd.f32 1.0, %v1860_v59 }
 0x519   :  { %1873 = vrcp.f32 %v1446_v60 }
 0x51a   :  { %1875 = vrcp.f32 %v1448_v61 }
 0x51c   :  { %v1862_v62 = vpop.eup %1861 }
 0x51d   :  { %v1864_v63 = vpop.eup %1863  ;;  %v1449_v0 = vadd.f32 1.0, %v1862_v62 }
 0x51e   :  { %v1866_v1 = vpop.eup %1865  ;;  %v1451_v2 = vadd.f32 1.0, %v1864_v63 }
 0x51f   :  { %v1868_v3 = vpop.eup %1867  ;;  %1877 = vrcp.f32 %v1449_v0  ;;  %v1450_v4 = vadd.f32 1.0, %v1866_v1 }
 0x520   :  { %1879 = vrcp.f32 %v1451_v2  ;;  %v1452_v5 = vadd.f32 1.0, %v1868_v3 }
 0x521   :  { %1881 = vrcp.f32 %v1450_v4 }
 0x522   :  { %1883 = vrcp.f32 %v1452_v5 }
 0x524   :  { %v1870_v6 = vpop.eup %1869 }
 0x525   :  { %v1872_v7 = vpop.eup %1871  ;;  %1469 = vst [vmem:[#allocation4] sm:$0xff] %v1870_v6 }
 0x526   :  { %v1874_v8 = vpop.eup %1873  ;;  %1471 = vst [vmem:[#allocation4 + $0x10] sm:$0xff] %v1872_v7 }
 0x527   :  { %v1876_v9 = vpop.eup %1875  ;;  %1470 = vst [vmem:[#allocation4 + $0x8] sm:$0xff] %v1874_v8 }
 0x528   :  { %1472 = vst [vmem:[#allocation4 + $0x18] sm:$0xff] %v1876_v9 }
 0x52c   :  { %v1878_v10 = vpop.eup %1877 }
 0x52d   :  { %v1880_v11 = vpop.eup %1879  ;;  %1473 = vst [vmem:[#allocation4 + $0x20] sm:$0xff] %v1878_v10 }
 0x52e   :  { %v1882_v12 = vpop.eup %1881  ;;  %1475 = vst [vmem:[#allocation4 + $0x30] sm:$0xff] %v1880_v11 }
 0x52f   :  { %v1884_v13 = vpop.eup %1883  ;;  %1474 = vst [vmem:[#allocation4 + $0x28] sm:$0xff] %v1882_v12 }
 0x530   :  { %1476 = vst [vmem:[#allocation4 + $0x38] sm:$0xff] %v1884_v13 }
 0x531   :  { %1916 = shalt.err (!%p1913_p9)
}
 0x532   :  { %1496 = dma.vmem_to_hbm [thread:$0]  %s1494_s16, 1024, %s2381_s17, [#allocation5]  }
 0x533   :  { %1925 = dma.done.wait [#allocation3], 128  }
 0x534   :  { %1926 = vsyncadd [#allocation3], 4294967168 }
 0x535   :  { %1927 = dma.done.wait [#allocation5], 1024  }
 0x536   :  { %1928 = vsyncadd [#allocation5], 4294966272 }
 0x537   :  { %1503 = vsyncpa [#allocation3], 1 }
 0x538   :  { %1504 = vsyncpa [#allocation5], 1 }

</bundles_post_ra>
